<compile_context>
chip_gen: v7x
topology: tpu7x:2x2x1
jax: 0.10.0
libtpu: 0.0.40
codegen_flags: <defaults>
</compile_context>

<pallas_src>
import math

import jax
import jax.numpy as jnp
from jax import lax
from jax.experimental import pallas as pl
from jax.experimental.pallas import tpu as pltpu


def _tensorcores_per_chip() -> int:
    """2 on v7x-class chips (two TensorCores share the grid), else 1."""
    try:
        kind = jax.devices()[0].device_kind.lower()
    except Exception:
        return 1
    return 2 if ("v7" in kind or "7x" in kind) else 1


def _vq_kernel(x_ref, esc_ref, edq_ref, e2h_ref, q_ref, ind_ref):
    """One grid step: `tp` lane-packed rows (= tp*P flat rows) vs. the full codebook.

    x_ref   : (tp, W)   W = P*D; packed row p holds flat rows P*p .. P*p+P-1
    esc_ref : (P, W, K) block-diagonal score RHS:   esc[g, g*D+d, k] = E[k, d]
    edq_ref : (P, K, W) block-diagonal dequant RHS: edq[g, k, g*D+d] = E[k, d]
    e2h_ref : (1, K)    0.5 * ||E_k||^2  (f32, precomputed once)
    q_ref   : (tp, W)   packed quantized rows (codebook dtype)
    ind_ref : (tp, P)   code index of flat row P*p+g at [p, g] (int32)
    """
    P, _, K = esc_ref.shape
    tp = x_ref.shape[0]

    x = x_ref[...]                                      # (tp, W) native dtype -> MXU
    e2h = e2h_ref[...]                                  # (1, K) f32
    lane = lax.broadcasted_iota(jnp.int32, (tp, K), 1)  # code ids
    col = lax.broadcasted_iota(jnp.int32, (tp, P), 1)   # sub-row ids

    q_acc = None
    ind_block = jnp.zeros((tp, P), dtype=jnp.int32)
    for g in range(P):  # P is a small static constant -> fully unrolled
        # score_k = x_g . E_k - 0.5*||E_k||^2 : argmax-equivalent to the full
        # negative squared distance (per-row ||x||^2 is a constant offset, the
        # factor 2 is folded into the bias).  The block-diagonal RHS selects
        # lanes [g*D, (g+1)*D) of the packed row inside the matmul, so no lane
        # unpacking / relayout is ever needed.
        scores = lax.dot_general(x, esc_ref[g], (((1,), (0,)), ((), ())),
                                 preferred_element_type=jnp.float32) - e2h  # (tp, K)

        # first-occurrence argmax over codes (matches torch .max().indices)
        max_val = jnp.max(scores, axis=-1, keepdims=True)                   # (tp, 1)
        ind_g = jnp.min(jnp.where(scores == max_val, lane, K),
                        axis=-1, keepdims=True)                             # (tp, 1)
        onehot = (lane == ind_g).astype(edq_ref.dtype)                      # (tp, K)

        # dequantize on the (otherwise idle) MXU; edq's block structure writes
        # the selected code directly into lanes [g*D, (g+1)*D) of the packed row.
        qg = lax.dot_general(onehot, edq_ref[g], (((1,), (0,)), ((), ())),
                             preferred_element_type=jnp.float32)            # (tp, W)
        q_acc = qg if q_acc is None else q_acc + qg
        ind_block = jnp.where(col == g, ind_g, ind_block)

    q_ref[...] = q_acc.astype(q_ref.dtype)   # fully lane-dense, unmasked stores
    ind_ref[...] = ind_block


def euclidean_codebook_forward(x, embed, x_len=None, *, tile_n=4096):
    """Eval-mode forward of EuclideanCodebook. x: [..., D], embed: [K, D]."""
    del x_len  # only used by the training/masking branch (not taken in eval)
    lead_shape = x.shape[:-1]
    D = x.shape[-1]
    K, Dk = embed.shape
    assert D == Dk, "codebook dim mismatch"
    N = math.prod(lead_shape)

    # Lane-packing factor: P flat rows per 128-lane packed row (P=4 at D=32).
    P = 128 // D if (D < 128 and 128 % D == 0) else 1
    W = P * D

    x_flat = x.reshape(N, D)
    pad = (-N) % P
    if pad:
        # TODO(synk): rare corner case (N not a multiple of the packing factor)
        # costs one extra copy of x / q; typical B*T is a multiple of 4.
        x_flat = jnp.pad(x_flat, ((0, pad), (0, 0)))
    N_pk = N + pad
    Np = N_pk // P
    x_packed = x_flat.reshape(Np, W)          # free reshape, 128-lane dense

    # ---- tiling: big packed tiles amortize the ~0.35us/step grid overhead ----
    cores = _tensorcores_per_chip()
    tp_target = max(1, tile_n // P)
    if cores >= 2:
        # v7x only: keep >= 2 grid steps so both TensorCores get work.
        tp_target = min(tp_target, pl.cdiv(Np, 2))
    if tp_target >= Np:
        tp = Np                                # single tile; block == full array
    else:
        tp = min(Np, max(8, (tp_target // 8) * 8))
    num_tiles = pl.cdiv(Np, tp)                # ragged trailing tile handled by Pallas

    # ---- hoisted codebook operands (computed once per call, tiny) ----
    ef32 = embed.astype(jnp.float32)
    e2_half = (0.5 * jnp.sum(ef32 * ef32, axis=-1))[None, :]        # (1, K) f32
    esc = jnp.zeros((P, W, K), dtype=embed.dtype)                   # score RHS
    edq = jnp.zeros((P, K, W), dtype=embed.dtype)                   # dequant RHS
    for g in range(P):
        esc = esc.at[g, g * D:(g + 1) * D, :].set(embed.T)
        edq = edq.at[g, :, g * D:(g + 1) * D].set(embed)

    q_packed, ind_packed = pl.pallas_call(
        _vq_kernel,
        out_shape=(
            jax.ShapeDtypeStruct((Np, W), embed.dtype),   # F.embedding -> codebook dtype
            jax.ShapeDtypeStruct((Np, P), jnp.int32),
        ),
        grid_spec=pltpu.PrefetchScalarGridSpec(
            num_scalar_prefetch=0,
            grid=(num_tiles,),
            in_specs=[
                pl.BlockSpec((tp, W), lambda i: (i, 0)),      # packed x tile
                pl.BlockSpec((P, W, K), lambda i: (0, 0, 0)),  # score RHS (resident)
                pl.BlockSpec((P, K, W), lambda i: (0, 0, 0)),  # dequant RHS (resident)
                pl.BlockSpec((1, K), lambda i: (0, 0)),        # 0.5*||E||^2 (resident)
            ],
            out_specs=[
                pl.BlockSpec((tp, W), lambda i: (i, 0)),       # packed quantize tile
                pl.BlockSpec((tp, P), lambda i: (i, 0)),       # per-sub-row indices
            ],
        ),
        compiler_params=pltpu.CompilerParams(
            dimension_semantics=("parallel",),
            vmem_limit_bytes=48 * 1024 * 1024,
        ),
    )(x_packed, esc, edq, e2_half)

    if pad:
        q_flat = q_packed.reshape(N_pk, D)[:N]
        ind_flat = ind_packed.reshape(N_pk)[:N]
    else:
        q_flat = q_packed.reshape(N, D)       # free reshapes, no copies
        ind_flat = ind_packed.reshape(N)

    quantize = q_flat.reshape(*lead_shape, D)
    embed_ind = ind_flat.reshape(lead_shape)
    commit_loss = jnp.zeros((), dtype=jnp.float32)   # eval path: no codebook update
    # TODO(synk): training-time EMA codebook update / kmeans init / dead-code
    # expiration are stateful, distributed host-side ops and are not part of the
    # inference hot path; not implemented here.
    return quantize, commit_loss, embed_ind


def _reference_forward(x, embed):
    lead_shape = x.shape[:-1]
    D = x.shape[-1]
    xf = x.reshape(-1, D).astype(jnp.float32)
    e = embed.astype(jnp.float32)
    dist = -(jnp.sum(xf * xf, 1, keepdims=True) - 2.0 * xf @ e.T
             + jnp.sum(e * e, 1)[None, :])
    ind = jnp.argmax(dist, axis=-1)
    q = embed[ind].reshape(*lead_shape, D)
    return q, ind.reshape(lead_shape)


if __name__ == "__main__":
    # Module config: dim=32, codebook_size=64 ; input: B=2, T=8, D=32.
    dim, codebook_size = 32, 64
    B, T = 2, 8

    key = jax.random.PRNGKey(0)
    k_embed, k_x = jax.random.split(key)

    # uniform_init == kaiming_uniform_ on (codebook_size, dim):
    # bound = sqrt(2) * sqrt(3 / fan_in), fan_in = dim.
    bound = math.sqrt(2.0) * math.sqrt(3.0 / dim)
    embed = jax.random.uniform(k_embed, (codebook_size, dim),
                               minval=-bound, maxval=bound, dtype=jnp.float32)

    x = jax.random.normal(k_x, (B, T, dim), dtype=jnp.float32)
    x_len = jnp.full((B,), T, dtype=jnp.int32)

    quantize, commit_loss, embed_ind = euclidean_codebook_forward(x, embed, x_len)
    jax.block_until_ready((quantize, commit_loss, embed_ind))

    # sanity check against a plain-JAX reference
    q_ref, ind_ref = _reference_forward(x, embed)
    assert embed_ind.shape == (B, T)
    assert quantize.shape == (B, T, dim)
    assert jnp.all(embed_ind == ind_ref), "index mismatch"
    assert jnp.allclose(quantize, q_ref, atol=1e-5, rtol=1e-5), "dequantize mismatch"
    assert float(commit_loss) == 0.0

    print("KERNEL_OK")
</pallas_src>

<mosaic_0001>
module attributes {stable_mosaic.version = 11 : i64} {
  func.func @_vq_kernel(%arg0: i32, %arg1: memref<4x128xf32, #tpu.memory_space<vmem>>, %arg2: memref<4x128x64xf32, #tpu.memory_space<vmem>>, %arg3: memref<4x64x128xf32, #tpu.memory_space<vmem>>, %arg4: memref<1x64xf32, #tpu.memory_space<vmem>>, %arg5: memref<4x128xf32, #tpu.memory_space<vmem>>, %arg6: memref<4x4xi32, #tpu.memory_space<vmem>>) attributes {dimension_semantics = [#tpu.dimension_semantics<parallel>], iteration_bounds = array<i64: 1>, scalar_prefetch = 0 : i64, scratch_operands = 0 : i64, tpu.core_type = #tpu.core_type<tc>, window_params = [{transform_indices = @transform_0, window_bounds = array<i64: 4, 128>}, {pipeline_mode = #tpu.pipeline_mode<synchronous>, transform_indices = @transform_1, window_bounds = array<i64: 4, 128, 64>}, {pipeline_mode = #tpu.pipeline_mode<synchronous>, transform_indices = @transform_2, window_bounds = array<i64: 4, 64, 128>}, {pipeline_mode = #tpu.pipeline_mode<synchronous>, transform_indices = @transform_3, window_bounds = array<i64: 1, 64>}, {transform_indices = @transform_4, window_bounds = array<i64: 4, 128>}, {transform_indices = @transform_5, window_bounds = array<i64: 4, 4>}]} {
    %c0 = arith.constant 0 : index
    %c0_0 = arith.constant 0 : index
    %0 = vector.load %arg1[%c0, %c0_0] : memref<4x128xf32, #tpu.memory_space<vmem>>, vector<4x128xf32>
    %c0_1 = arith.constant 0 : index
    %c0_2 = arith.constant 0 : index
    %1 = vector.load %arg4[%c0_1, %c0_2] : memref<1x64xf32, #tpu.memory_space<vmem>>, vector<1x64xf32>
    %2 = tpu.iota {dimensions = array<i32: 1>} : vector<4x64xi32>
    %3 = tpu.iota {dimensions = array<i32: 1>} : vector<4x4xi32>
    %c0_i32 = arith.constant 0 : i32
    %4 = vector.broadcast %c0_i32 : i32 to vector<4x4xi32>
    %c0_3 = arith.constant 0 : index
    %c0_4 = arith.constant 0 : index
    %c0_5 = arith.constant 0 : index
    %5 = vector.load %arg2[%c0_3, %c0_4, %c0_5] : memref<4x128x64xf32, #tpu.memory_space<vmem>>, vector<1x128x64xf32>
    %6 = vector.shape_cast %5 : vector<1x128x64xf32> to vector<128x64xf32>
    %cst = arith.constant dense<0.000000e+00> : vector<4x64xf32>
    %7 = tpu.matmul %0, %6, %cst {dimension_numbers = #tpu.dot_dimension_numbers<[1], [0], [0], [1], [0, 0, 1, 1], [], []>} : vector<4x128xf32>, vector<128x64xf32>, vector<4x64xf32> -> vector<4x64xf32>
    %8 = vector.broadcast %1 : vector<1x64xf32> to vector<4x64xf32>
    %9 = arith.subf %7, %8 : vector<4x64xf32>
    %cst_6 = arith.constant dense<0xFF800000> : vector<4xf32>
    %10 = vector.multi_reduction <maximumf>, %9, %cst_6 [1] : vector<4x64xf32> to vector<4xf32>
    %11 = vector.shape_cast %10 : vector<4xf32> to vector<4x1xf32>
    %12 = vector.broadcast %11 : vector<4x1xf32> to vector<4x64xf32>
    %13 = arith.cmpf oeq, %9, %12 : vector<4x64xf32>
    %c64_i32 = arith.constant 64 : i32
    %14 = vector.broadcast %c64_i32 : i32 to vector<4x64xi32>
    %15 = arith.select %13, %2, %14 : vector<4x64xi1>, vector<4x64xi32>
    %cst_7 = arith.constant dense<2147483647> : vector<4xi32>
    %16 = vector.multi_reduction <minsi>, %15, %cst_7 [1] : vector<4x64xi32> to vector<4xi32>
    %17 = vector.shape_cast %16 : vector<4xi32> to vector<4x1xi32>
    %18 = vector.broadcast %17 : vector<4x1xi32> to vector<4x64xi32>
    %19 = arith.cmpi eq, %2, %18 : vector<4x64xi32>
    %20 = arith.extui %19 : vector<4x64xi1> to vector<4x64xi32>
    %21 = arith.sitofp %20 : vector<4x64xi32> to vector<4x64xf32>
    %c0_8 = arith.constant 0 : index
    %c0_9 = arith.constant 0 : index
    %c0_10 = arith.constant 0 : index
    %22 = vector.load %arg3[%c0_8, %c0_9, %c0_10] : memref<4x64x128xf32, #tpu.memory_space<vmem>>, vector<1x64x128xf32>
    %23 = vector.shape_cast %22 : vector<1x64x128xf32> to vector<64x128xf32>
    %cst_11 = arith.constant dense<0.000000e+00> : vector<4x128xf32>
    %24 = tpu.matmul %21, %23, %cst_11 {dimension_numbers = #tpu.dot_dimension_numbers<[1], [0], [0], [1], [0, 0, 1, 1], [], []>} : vector<4x64xf32>, vector<64x128xf32>, vector<4x128xf32> -> vector<4x128xf32>
    %c0_i32_12 = arith.constant 0 : i32
    %25 = vector.broadcast %c0_i32_12 : i32 to vector<4x4xi32>
    %26 = arith.cmpi eq, %3, %25 : vector<4x4xi32>
    %27 = vector.shape_cast %17 : vector<4x1xi32> to vector<4x1xi32>
    %28 = vector.broadcast %27 : vector<4x1xi32> to vector<4x4xi32>
    %29 = arith.select %26, %28, %4 : vector<4x4xi1>, vector<4x4xi32>
    %c1 = arith.constant 1 : index
    %c0_13 = arith.constant 0 : index
    %c0_14 = arith.constant 0 : index
    %30 = vector.load %arg2[%c1, %c0_13, %c0_14] : memref<4x128x64xf32, #tpu.memory_space<vmem>>, vector<1x128x64xf32>
    %31 = vector.shape_cast %30 : vector<1x128x64xf32> to vector<128x64xf32>
    %cst_15 = arith.constant dense<0.000000e+00> : vector<4x64xf32>
    %32 = tpu.matmul %0, %31, %cst_15 {dimension_numbers = #tpu.dot_dimension_numbers<[1], [0], [0], [1], [0, 0, 1, 1], [], []>} : vector<4x128xf32>, vector<128x64xf32>, vector<4x64xf32> -> vector<4x64xf32>
    %33 = vector.broadcast %1 : vector<1x64xf32> to vector<4x64xf32>
    %34 = arith.subf %32, %33 : vector<4x64xf32>
    %cst_16 = arith.constant dense<0xFF800000> : vector<4xf32>
    %35 = vector.multi_reduction <maximumf>, %34, %cst_16 [1] : vector<4x64xf32> to vector<4xf32>
    %36 = vector.shape_cast %35 : vector<4xf32> to vector<4x1xf32>
    %37 = vector.broadcast %36 : vector<4x1xf32> to vector<4x64xf32>
    %38 = arith.cmpf oeq, %34, %37 : vector<4x64xf32>
    %c64_i32_17 = arith.constant 64 : i32
    %39 = vector.broadcast %c64_i32_17 : i32 to vector<4x64xi32>
    %40 = arith.select %38, %2, %39 : vector<4x64xi1>, vector<4x64xi32>
    %cst_18 = arith.constant dense<2147483647> : vector<4xi32>
    %41 = vector.multi_reduction <minsi>, %40, %cst_18 [1] : vector<4x64xi32> to vector<4xi32>
    %42 = vector.shape_cast %41 : vector<4xi32> to vector<4x1xi32>
    %43 = vector.broadcast %42 : vector<4x1xi32> to vector<4x64xi32>
    %44 = arith.cmpi eq, %2, %43 : vector<4x64xi32>
    %45 = arith.extui %44 : vector<4x64xi1> to vector<4x64xi32>
    %46 = arith.sitofp %45 : vector<4x64xi32> to vector<4x64xf32>
    %c1_19 = arith.constant 1 : index
    %c0_20 = arith.constant 0 : index
    %c0_21 = arith.constant 0 : index
    %47 = vector.load %arg3[%c1_19, %c0_20, %c0_21] : memref<4x64x128xf32, #tpu.memory_space<vmem>>, vector<1x64x128xf32>
    %48 = vector.shape_cast %47 : vector<1x64x128xf32> to vector<64x128xf32>
    %cst_22 = arith.constant dense<0.000000e+00> : vector<4x128xf32>
    %49 = tpu.matmul %46, %48, %cst_22 {dimension_numbers = #tpu.dot_dimension_numbers<[1], [0], [0], [1], [0, 0, 1, 1], [], []>} : vector<4x64xf32>, vector<64x128xf32>, vector<4x128xf32> -> vector<4x128xf32>
    %50 = arith.addf %24, %49 : vector<4x128xf32>
    %c1_i32 = arith.constant 1 : i32
    %51 = vector.broadcast %c1_i32 : i32 to vector<4x4xi32>
    %52 = arith.cmpi eq, %3, %51 : vector<4x4xi32>
    %53 = vector.shape_cast %42 : vector<4x1xi32> to vector<4x1xi32>
    %54 = vector.broadcast %53 : vector<4x1xi32> to vector<4x4xi32>
    %55 = arith.select %52, %54, %29 : vector<4x4xi1>, vector<4x4xi32>
    %c2 = arith.constant 2 : index
    %c0_23 = arith.constant 0 : index
    %c0_24 = arith.constant 0 : index
    %56 = vector.load %arg2[%c2, %c0_23, %c0_24] : memref<4x128x64xf32, #tpu.memory_space<vmem>>, vector<1x128x64xf32>
    %57 = vector.shape_cast %56 : vector<1x128x64xf32> to vector<128x64xf32>
    %cst_25 = arith.constant dense<0.000000e+00> : vector<4x64xf32>
    %58 = tpu.matmul %0, %57, %cst_25 {dimension_numbers = #tpu.dot_dimension_numbers<[1], [0], [0], [1], [0, 0, 1, 1], [], []>} : vector<4x128xf32>, vector<128x64xf32>, vector<4x64xf32> -> vector<4x64xf32>
    %59 = vector.broadcast %1 : vector<1x64xf32> to vector<4x64xf32>
    %60 = arith.subf %58, %59 : vector<4x64xf32>
    %cst_26 = arith.constant dense<0xFF800000> : vector<4xf32>
    %61 = vector.multi_reduction <maximumf>, %60, %cst_26 [1] : vector<4x64xf32> to vector<4xf32>
    %62 = vector.shape_cast %61 : vector<4xf32> to vector<4x1xf32>
    %63 = vector.broadcast %62 : vector<4x1xf32> to vector<4x64xf32>
    %64 = arith.cmpf oeq, %60, %63 : vector<4x64xf32>
    %c64_i32_27 = arith.constant 64 : i32
    %65 = vector.broadcast %c64_i32_27 : i32 to vector<4x64xi32>
    %66 = arith.select %64, %2, %65 : vector<4x64xi1>, vector<4x64xi32>
    %cst_28 = arith.constant dense<2147483647> : vector<4xi32>
    %67 = vector.multi_reduction <minsi>, %66, %cst_28 [1] : vector<4x64xi32> to vector<4xi32>
    %68 = vector.shape_cast %67 : vector<4xi32> to vector<4x1xi32>
    %69 = vector.broadcast %68 : vector<4x1xi32> to vector<4x64xi32>
    %70 = arith.cmpi eq, %2, %69 : vector<4x64xi32>
    %71 = arith.extui %70 : vector<4x64xi1> to vector<4x64xi32>
    %72 = arith.sitofp %71 : vector<4x64xi32> to vector<4x64xf32>
    %c2_29 = arith.constant 2 : index
    %c0_30 = arith.constant 0 : index
    %c0_31 = arith.constant 0 : index
    %73 = vector.load %arg3[%c2_29, %c0_30, %c0_31] : memref<4x64x128xf32, #tpu.memory_space<vmem>>, vector<1x64x128xf32>
    %74 = vector.shape_cast %73 : vector<1x64x128xf32> to vector<64x128xf32>
    %cst_32 = arith.constant dense<0.000000e+00> : vector<4x128xf32>
    %75 = tpu.matmul %72, %74, %cst_32 {dimension_numbers = #tpu.dot_dimension_numbers<[1], [0], [0], [1], [0, 0, 1, 1], [], []>} : vector<4x64xf32>, vector<64x128xf32>, vector<4x128xf32> -> vector<4x128xf32>
    %76 = arith.addf %50, %75 : vector<4x128xf32>
    %c2_i32 = arith.constant 2 : i32
    %77 = vector.broadcast %c2_i32 : i32 to vector<4x4xi32>
    %78 = arith.cmpi eq, %3, %77 : vector<4x4xi32>
    %79 = vector.shape_cast %68 : vector<4x1xi32> to vector<4x1xi32>
    %80 = vector.broadcast %79 : vector<4x1xi32> to vector<4x4xi32>
    %81 = arith.select %78, %80, %55 : vector<4x4xi1>, vector<4x4xi32>
    %c3 = arith.constant 3 : index
    %c0_33 = arith.constant 0 : index
    %c0_34 = arith.constant 0 : index
    %82 = vector.load %arg2[%c3, %c0_33, %c0_34] : memref<4x128x64xf32, #tpu.memory_space<vmem>>, vector<1x128x64xf32>
    %83 = vector.shape_cast %82 : vector<1x128x64xf32> to vector<128x64xf32>
    %cst_35 = arith.constant dense<0.000000e+00> : vector<4x64xf32>
    %84 = tpu.matmul %0, %83, %cst_35 {dimension_numbers = #tpu.dot_dimension_numbers<[1], [0], [0], [1], [0, 0, 1, 1], [], []>} : vector<4x128xf32>, vector<128x64xf32>, vector<4x64xf32> -> vector<4x64xf32>
    %85 = vector.broadcast %1 : vector<1x64xf32> to vector<4x64xf32>
    %86 = arith.subf %84, %85 : vector<4x64xf32>
    %cst_36 = arith.constant dense<0xFF800000> : vector<4xf32>
    %87 = vector.multi_reduction <maximumf>, %86, %cst_36 [1] : vector<4x64xf32> to vector<4xf32>
    %88 = vector.shape_cast %87 : vector<4xf32> to vector<4x1xf32>
    %89 = vector.broadcast %88 : vector<4x1xf32> to vector<4x64xf32>
    %90 = arith.cmpf oeq, %86, %89 : vector<4x64xf32>
    %c64_i32_37 = arith.constant 64 : i32
    %91 = vector.broadcast %c64_i32_37 : i32 to vector<4x64xi32>
    %92 = arith.select %90, %2, %91 : vector<4x64xi1>, vector<4x64xi32>
    %cst_38 = arith.constant dense<2147483647> : vector<4xi32>
    %93 = vector.multi_reduction <minsi>, %92, %cst_38 [1] : vector<4x64xi32> to vector<4xi32>
    %94 = vector.shape_cast %93 : vector<4xi32> to vector<4x1xi32>
    %95 = vector.broadcast %94 : vector<4x1xi32> to vector<4x64xi32>
    %96 = arith.cmpi eq, %2, %95 : vector<4x64xi32>
    %97 = arith.extui %96 : vector<4x64xi1> to vector<4x64xi32>
    %98 = arith.sitofp %97 : vector<4x64xi32> to vector<4x64xf32>
    %c3_39 = arith.constant 3 : index
    %c0_40 = arith.constant 0 : index
    %c0_41 = arith.constant 0 : index
    %99 = vector.load %arg3[%c3_39, %c0_40, %c0_41] : memref<4x64x128xf32, #tpu.memory_space<vmem>>, vector<1x64x128xf32>
    %100 = vector.shape_cast %99 : vector<1x64x128xf32> to vector<64x128xf32>
    %cst_42 = arith.constant dense<0.000000e+00> : vector<4x128xf32>
    %101 = tpu.matmul %98, %100, %cst_42 {dimension_numbers = #tpu.dot_dimension_numbers<[1], [0], [0], [1], [0, 0, 1, 1], [], []>} : vector<4x64xf32>, vector<64x128xf32>, vector<4x128xf32> -> vector<4x128xf32>
    %102 = arith.addf %76, %101 : vector<4x128xf32>
    %c3_i32 = arith.constant 3 : i32
    %103 = vector.broadcast %c3_i32 : i32 to vector<4x4xi32>
    %104 = arith.cmpi eq, %3, %103 : vector<4x4xi32>
    %105 = vector.shape_cast %94 : vector<4x1xi32> to vector<4x1xi32>
    %106 = vector.broadcast %105 : vector<4x1xi32> to vector<4x4xi32>
    %107 = arith.select %104, %106, %81 : vector<4x4xi1>, vector<4x4xi32>
    %c0_43 = arith.constant 0 : index
    %c0_44 = arith.constant 0 : index
    %108 = vector.load %arg5[%c0_43, %c0_44] : memref<4x128xf32, #tpu.memory_space<vmem>>, vector<4x128xf32>
    tpu.vector_store %arg5[%c0_43, %c0_44], %102 {strides = array<i32>} : memref<4x128xf32, #tpu.memory_space<vmem>>, vector<4x128xf32>,
    %c0_45 = arith.constant 0 : index
    %c0_46 = arith.constant 0 : index
    %109 = vector.load %arg6[%c0_45, %c0_46] : memref<4x4xi32, #tpu.memory_space<vmem>>, vector<4x4xi32>
    tpu.vector_store %arg6[%c0_45, %c0_46], %107 {strides = array<i32>} : memref<4x4xi32, #tpu.memory_space<vmem>>, vector<4x4xi32>,
    return
  }
  func.func @transform_0(%arg0: i32) -> (i32, i32) {
    %c0_i32 = arith.constant 0 : i32
    %c0_i32_0 = arith.constant 0 : i32
    return %arg0, %c0_i32 : i32, i32
  }
  func.func @transform_1(%arg0: i32) -> (i32, i32, i32) {
    %c0_i32 = arith.constant 0 : i32
    %c0_i32_0 = arith.constant 0 : i32
    %c0_i32_1 = arith.constant 0 : i32
    %c0_i32_2 = arith.constant 0 : i32
    return %c0_i32, %c0_i32_0, %c0_i32_1 : i32, i32, i32
  }
  func.func @transform_2(%arg0: i32) -> (i32, i32, i32) {
    %c0_i32 = arith.constant 0 : i32
    %c0_i32_0 = arith.constant 0 : i32
    %c0_i32_1 = arith.constant 0 : i32
    %c0_i32_2 = arith.constant 0 : i32
    return %c0_i32, %c0_i32_0, %c0_i32_1 : i32, i32, i32
  }
  func.func @transform_3(%arg0: i32) -> (i32, i32) {
    %c0_i32 = arith.constant 0 : i32
    %c0_i32_0 = arith.constant 0 : i32
    %c0_i32_1 = arith.constant 0 : i32
    return %c0_i32, %c0_i32_0 : i32, i32
  }
  func.func @transform_4(%arg0: i32) -> (i32, i32) {
    %c0_i32 = arith.constant 0 : i32
    %c0_i32_0 = arith.constant 0 : i32
    return %arg0, %c0_i32 : i32, i32
  }
  func.func @transform_5(%arg0: i32) -> (i32, i32) {
    %c0_i32 = arith.constant 0 : i32
    %c0_i32_0 = arith.constant 0 : i32
    return %arg0, %c0_i32 : i32, i32
  }
}

</mosaic_0001>

<bundles_post_ra>
// kernel: tpu_custom_call.1
= control target key start
LH: loop header
LB: loop body
LE: loop exit
PB: predicated region body
PF: predicated region fallthrough
CT: control target
= control target key end

     0   :  { %11 = vsyncpa [#allocation3], 0  ;;  %v1448_v3 = vmov 0.0|0.0   ;;  %vm1449_vm0 = vmmov 0   ;;  %v1450_v11 = vmov 0.0   ;;  %s1912_s0 = inlined_call_operand.vmem [shape: f32[4,128], index: 0, kind: input, shape index: {}]   ;;  %s1913_s1 = inlined_call_operand.vmem [shape: f32[4,128,64], index: 1, kind: input, shape index: {}]   ;;  %s1914_s2 = inlined_call_operand.vmem [shape: f32[4,64,128], index: 2, kind: input, shape index: {}]   ;;  %s1915_s3 = inlined_call_operand.vmem [shape: f32[1,64], index: 3, kind: input, shape index: {}]   ;;  %s1916_s4 = inlined_call_operand.hbm [shape: f32[4,128], index: 4, kind: output, shape index: {0}]   ;;  %s1917_s5 = inlined_call_operand.hbm [shape: s32[4,4], index: 5, kind: output, shape index: {1}]  }
   0x1   :  { %v846_v0 = vld [vmem:[%s1913_s1 + $0x80] sm:$0xff]  ;;  %v847_v1 = vld [vmem:[%s1913_s1 + $0x88] sm:$0xff]  ;;  %1269 = vmatprep.subr.bf16.mxu1 %v1448_v3  ;;  %1245 = vmatprep.subr.bf16.mxu0 %v1448_v3  ;;  %v848_v6 = vld [vmem:[%s1913_s1 + $0x90] sm:$0xff] }
   0x2   :  { %v25_v2 = vld [vmem:[%s1913_s1] sm:$0xff]  ;;  %v1270_v4 = vpack.c.bf16 %v847_v1, %v846_v0  ;;  %v26_v5 = vld [vmem:[%s1913_s1 + $0x8] sm:$0xff]  ;;  %v849_v7 = vld [vmem:[%s1913_s1 + $0x98] sm:$0xff]  ;;  %1096 = vmatprep.mubr.msk.f32.mxu1 %vm1449_vm0, %v1450_v11  ;;  %1061 = vmatprep.mubr.msk.f32.mxu0 %vm1449_vm0, %v1450_v11 }
   0x3   :  { %v1246_v8 = vpack.c.bf16 %v26_v5, %v25_v2  ;;  %v27_v9 = vld [vmem:[%s1913_s1 + $0x10] sm:$0xff]  ;;  %v28_v10 = vld [vmem:[%s1913_s1 + $0x18] sm:$0xff]  ;;  %v1273_v12 = vpack.c.bf16 %v849_v7, %v848_v6  ;;  %v850_v14 = vld [vmem:[%s1913_s1 + $0xa0] sm:$0xff] }
   0x4   :  { %1271 = vmatpush3.bf16.msra.mxu1 %v1270_v4  ;;  %v1249_v13 = vpack.c.bf16 %v28_v10, %v27_v9  ;;  %v851_v15 = vld [vmem:[%s1913_s1 + $0xa8] sm:$0xff]  ;;  %v29_v16 = vld [vmem:[%s1913_s1 + $0x20] sm:$0xff]  ;;  %v852_v20 = vld [vmem:[%s1913_s1 + $0xb0] sm:$0xff] }
   0x5   :  { %1272 = vmatprep.subr.bf16.mxu1 %v1448_v3  ;;  %1247 = vmatpush3.bf16.msra.mxu0 %v1246_v8  ;;  %v30_v17 = vld [vmem:[%s1913_s1 + $0x28] sm:$0xff]  ;;  %v1276_v18 = vpack.c.bf16 %v851_v15, %v850_v14  ;;  %v853_v21 = vld [vmem:[%s1913_s1 + $0xb8] sm:$0xff]  ;;  %v31_v22 = vld [vmem:[%s1913_s1 + $0x30] sm:$0xff] }
   0x6   :  { %1248 = vmatprep.subr.bf16.mxu0 %v1448_v3  ;;  %v1252_v19 = vpack.c.bf16 %v30_v17, %v29_v16  ;;  %v32_v23 = vld [vmem:[%s1913_s1 + $0x38] sm:$0xff]  ;;  %v1279_v24 = vpack.c.bf16 %v853_v21, %v852_v20  ;;  %v854_v26 = vld [vmem:[%s1913_s1 + $0xc0] sm:$0xff]  ;;  %v855_v27 = vld [vmem:[%s1913_s1 + $0xc8] sm:$0xff] }
   0x7   :  { %v1255_v25 = vpack.c.bf16 %v32_v23, %v31_v22  ;;  %v33_v28 = vld [vmem:[%s1913_s1 + $0x40] sm:$0xff]  ;;  %v34_v29 = vld [vmem:[%s1913_s1 + $0x48] sm:$0xff]  ;;  %v1282_v30 = vpack.c.bf16 %v855_v27, %v854_v26  ;;  %v856_v32 = vld [vmem:[%s1913_s1 + $0xd0] sm:$0xff] }
   0x8   :  { %1274 = vmatpush3.bf16.msra.mxu1 %v1273_v12  ;;  %v1258_v31 = vpack.c.bf16 %v34_v29, %v33_v28  ;;  %v857_v33 = vld [vmem:[%s1913_s1 + $0xd8] sm:$0xff]  ;;  %v35_v34 = vld [vmem:[%s1913_s1 + $0x50] sm:$0xff]  ;;  %v858_v38 = vld [vmem:[%s1913_s1 + $0xe0] sm:$0xff] }
   0x9   :  { %1275 = vmatprep.subr.bf16.mxu1 %v1448_v3  ;;  %1250 = vmatpush3.bf16.msra.mxu0 %v1249_v13  ;;  %v36_v35 = vld [vmem:[%s1913_s1 + $0x58] sm:$0xff]  ;;  %v1285_v36 = vpack.c.bf16 %v857_v33, %v856_v32  ;;  %v859_v39 = vld [vmem:[%s1913_s1 + $0xe8] sm:$0xff]  ;;  %v37_v40 = vld [vmem:[%s1913_s1 + $0x60] sm:$0xff] }
   0xa   :  { %1251 = vmatprep.subr.bf16.mxu0 %v1448_v3  ;;  %v1261_v37 = vpack.c.bf16 %v36_v35, %v35_v34  ;;  %v38_v41 = vld [vmem:[%s1913_s1 + $0x68] sm:$0xff] }
   0xc   :  { %1277 = vmatpush3.bf16.msra.mxu1 %v1276_v18 }
   0xd   :  { %1278 = vmatprep.subr.bf16.mxu1 %v1448_v3  ;;  %1253 = vmatpush3.bf16.msra.mxu0 %v1252_v19 }
   0xe   :  { %1254 = vmatprep.subr.bf16.mxu0 %v1448_v3 }
  0x10   :  { %1280 = vmatpush3.bf16.msra.mxu1 %v1279_v24 }
  0x11   :  { %1281 = vmatprep.subr.bf16.mxu1 %v1448_v3  ;;  %1256 = vmatpush3.bf16.msra.mxu0 %v1255_v25 }
  0x12   :  { %1257 = vmatprep.subr.bf16.mxu0 %v1448_v3 }
  0x14   :  { %1283 = vmatpush3.bf16.msra.mxu1 %v1282_v30 }
  0x15   :  { %1284 = vmatprep.subr.bf16.mxu1 %v1448_v3  ;;  %1259 = vmatpush3.bf16.msra.mxu0 %v1258_v31 }
  0x16   :  { %1260 = vmatprep.subr.bf16.mxu0 %v1448_v3 }
  0x17   :  { %12 = vsyncpa [#allocation5], 0  ;;  %v1288_v42 = vpack.c.bf16 %v859_v39, %v858_v38  ;;  %v1264_v43 = vpack.c.bf16 %v38_v41, %v37_v40  ;;  %v860_v44 = vld [vmem:[%s1913_s1 + $0xf0] sm:$0xff]  ;;  %v861_v45 = vld [vmem:[%s1913_s1 + $0xf8] sm:$0xff]  ;;  %vm118_vm1 = vcmask 519168   ;;  %vm272_vm10 = vcmask 523264  }
  0x18   :  { %1286 = vmatpush3.bf16.msra.mxu1 %v1285_v36  ;;  %v39_v46 = vld [vmem:[%s1913_s1 + $0x70] sm:$0xff]  ;;  %v40_v47 = vld [vmem:[%s1913_s1 + $0x78] sm:$0xff]  ;;  %v1291_v48 = vpack.c.bf16 %v861_v45, %v860_v44  ;;  %v873_v50 = vld [vmem:[%s1913_s1 + $0x100] sm:$0xff] }
  0x19   :  { %1287 = vmatprep.subr.bf16.mxu1 %v1448_v3  ;;  %1262 = vmatpush3.bf16.msra.mxu0 %v1261_v37  ;;  %v1267_v49 = vpack.c.bf16 %v40_v47, %v39_v46  ;;  %v874_v51 = vld [vmem:[%s1913_s1 + $0x108] sm:$0xff]  ;;  %v1608_v52 = vld [vmem:[%s1912_s0] sm:$0xf]  ;;  %v875_v54 = vld [vmem:[%s1913_s1 + $0x110] sm:$0xff] }
  0x1a   :  { %1263 = vmatprep.subr.bf16.mxu0 %v1448_v3  ;;  %v1318_v53 = vpack.c.bf16 %v874_v51, %v873_v50  ;;  %v876_v55 = vld [vmem:[%s1913_s1 + $0x118] sm:$0xff]  ;;  %v877_v57 = vld [vmem:[%s1913_s1 + $0x120] sm:$0xff]  ;;  %v878_v58 = vld [vmem:[%s1913_s1 + $0x128] sm:$0xff] }
  0x1b   :  { %v1321_v56 = vpack.c.bf16 %v876_v55, %v875_v54  ;;  %v1324_v59 = vpack.c.bf16 %v878_v58, %v877_v57  ;;  %v879_v60 = vld [vmem:[%s1913_s1 + $0x130] sm:$0xff]  ;;  %v880_v61 = vld [vmem:[%s1913_s1 + $0x138] sm:$0xff]  ;;  %v881_v63 = vld [vmem:[%s1913_s1 + $0x140] sm:$0xff]  ;;  %v23_v54 = vlaneseq }
  0x1c   :  { %1289 = vmatpush3.bf16.msra.mxu1 %v1288_v42  ;;  %v1327_v62 = vpack.c.bf16 %v880_v61, %v879_v60  ;;  %v882_v0 = vld [vmem:[%s1913_s1 + $0x148] sm:$0xff]  ;;  %v883_v2 = vld [vmem:[%s1913_s1 + $0x150] sm:$0xff]  ;;  %v884_v4 = vld [vmem:[%s1913_s1 + $0x158] sm:$0xff] }
  0x1d   :  { %1290 = vmatprep.subr.bf16.mxu1 %v1448_v3  ;;  %1265 = vmatpush3.bf16.msra.mxu0 %v1264_v43  ;;  %v1330_v1 = vpack.c.bf16 %v882_v0, %v881_v63  ;;  %v1333_v5 = vpack.c.bf16 %v884_v4, %v883_v2  ;;  %v885_v6 = vld [vmem:[%s1913_s1 + $0x160] sm:$0xff]  ;;  %v886_v7 = vld [vmem:[%s1913_s1 + $0x168] sm:$0xff]  ;;  %v887_v9 = vld [vmem:[%s1913_s1 + $0x170] sm:$0xff]  ;;  %v1734_v55 = vand.u32 127, %v23_v54 }
  0x1e   :  { %1266 = vmatprep.subr.bf16.mxu0 %v1448_v3  ;;  %v1336_v8 = vpack.c.bf16 %v886_v7, %v885_v6  ;;  %v888_v10 = vld [vmem:[%s1913_s1 + $0x178] sm:$0xff]  ;;  %v899_v13 = vld [vmem:[%s1913_s1 + $0x180] sm:$0xff]  ;;  %v900_v14 = vld [vmem:[%s1913_s1 + $0x188] sm:$0xff] }
  0x1f   :  { %v1339_v12 = vpack.c.bf16 %v888_v10, %v887_v9  ;;  %v1354_v15 = vpack.c.bf16 %v900_v14, %v899_v13  ;;  %v901_v16 = vld [vmem:[%s1913_s1 + $0x190] sm:$0xff]  ;;  %v902_v17 = vld [vmem:[%s1913_s1 + $0x198] sm:$0xff]  ;;  %v903_v19 = vld [vmem:[%s1913_s1 + $0x1a0] sm:$0xff]  ;;  %vm150_vm12 = vcmp.eq.s32.totalorder %v1734_v55, 0  ;;  %vm419_vm13 = vcmp.eq.s32.totalorder %v1734_v55, 1 }
  0x20   :  { %1292 = vmatpush3.bf16.msra.mxu1 %v1291_v48  ;;  %v1357_v18 = vpack.c.bf16 %v902_v17, %v901_v16  ;;  %v904_v20 = vld [vmem:[%s1913_s1 + $0x1a8] sm:$0xff]  ;;  %v905_v22 = vld [vmem:[%s1913_s1 + $0x1b0] sm:$0xff]  ;;  %v906_v23 = vld [vmem:[%s1913_s1 + $0x1b8] sm:$0xff] }
  0x21   :  { %1317 = vmatprep.subr.bf16.mxu1 %v1448_v3  ;;  %1268 = vmatpush3.bf16.msra.mxu0 %v1267_v49  ;;  %v1360_v21 = vpack.c.bf16 %v904_v20, %v903_v19  ;;  %v1363_v24 = vpack.c.bf16 %v906_v23, %v905_v22  ;;  %v907_v25 = vld [vmem:[%s1913_s1 + $0x1c0] sm:$0xff]  ;;  %v908_v26 = vld [vmem:[%s1913_s1 + $0x1c8] sm:$0xff]  ;;  %v909_v28 = vld [vmem:[%s1913_s1 + $0x1d0] sm:$0xff] }
  0x22   :  { %1293 = vmatprep.subr.bf16.mxu0 %v1448_v3  ;;  %v1366_v27 = vpack.c.bf16 %v908_v26, %v907_v25  ;;  %v910_v29 = vld [vmem:[%s1913_s1 + $0x1d8] sm:$0xff]  ;;  %v911_v31 = vld [vmem:[%s1913_s1 + $0x1e0] sm:$0xff]  ;;  %v912_v32 = vld [vmem:[%s1913_s1 + $0x1e8] sm:$0xff] }
  0x23   :  { %1097 = vmatmul.mubr.f32.vlgmr.msra.gmra.mrb[0].mxu1 %v1608_v52  ;;  %v1369_v30 = vpack.c.bf16 %v910_v29, %v909_v28  ;;  %v1372_v33 = vpack.c.bf16 %v912_v32, %v911_v31  ;;  %v913_v34 = vld [vmem:[%s1913_s1 + $0x1f0] sm:$0xff]  ;;  %v914_v35 = vld [vmem:[%s1913_s1 + $0x1f8] sm:$0xff]  ;;  %v844_v37 = vld [vmem:[%s1915_s3] ss:$0 sm:$0xff] }
  0x24   :  { %1319 = vmatpush3.bf16.msra.mxu1 %v1318_v53  ;;  %1062 = vmatmul.mubr.f32.vlgmr.msra.gmra.mrb[0].mxu0 %v1608_v52  ;;  %v1375_v36 = vpack.c.bf16 %v914_v35, %v913_v34  ;;  %v863_v14 = vld [vmem:[%s1914_s2 + $0x40] sm:$0xff]  ;;  %v865_v16 = vld [vmem:[%s1914_s2 + $0x50] sm:$0xff]  ;;  %v870_v32 = vld [vmem:[%s1914_s2 + $0x78] sm:$0xff] }
  0x25   :  { %1320 = vmatprep.subr.bf16.mxu1 %v1448_v3  ;;  %1169 = vmatprep.mubr.msk.f32.mxu1 %vm1449_vm0, %v1450_v11  ;;  %v867_v20 = vld [vmem:[%s1914_s2 + $0x60] sm:$0xff]  ;;  %v869_v31 = vld [vmem:[%s1914_s2 + $0x70] sm:$0xff] }
  0x26   :  { %1115 = vmatprep.mubr.msk.f32.mxu0 %vm1449_vm0, %v1450_v11  ;;  %v144_v54 = vld [vmem:[%s1914_s2 + $0x10] sm:$0xff] }
  0x28   :  { %1322 = vmatpush3.bf16.msra.mxu1 %v1321_v56 }
  0x29   :  { %1323 = vmatprep.subr.bf16.mxu1 %v1448_v3 }
  0x2c   :  { %1325 = vmatpush3.bf16.msra.mxu1 %v1324_v59 }
  0x2d   :  { %1326 = vmatprep.subr.bf16.mxu1 %v1448_v3 }
  0x30   :  { %1328 = vmatpush3.bf16.msra.mxu1 %v1327_v62 }
  0x31   :  { %1329 = vmatprep.subr.bf16.mxu1 %v1448_v3 }
  0x34   :  { %1331 = vmatpush3.bf16.msra.mxu1 %v1330_v1 }
  0x35   :  { %1332 = vmatprep.subr.bf16.mxu1 %v1448_v3 }
  0x38   :  { %1334 = vmatpush3.bf16.msra.mxu1 %v1333_v5 }
  0x39   :  { %1335 = vmatprep.subr.bf16.mxu1 %v1448_v3 }
  0x3c   :  { %1337 = vmatpush3.bf16.msra.mxu1 %v1336_v8 }
  0x3d   :  { %1338 = vmatprep.subr.bf16.mxu1 %v1448_v3 }
  0x40   :  { %1340 = vmatpush3.bf16.msra.mxu1 %v1339_v12 }
  0x41   :  { %1353 = vmatprep.subr.bf16.mxu1 %v1448_v3 }
  0x43   :  { %1170 = vmatmul.mubr.f32.vlgmr.msra.gmra.mrb[2].mxu1 %v1608_v52 }
  0x44   :  { %1355 = vmatpush3.bf16.msra.mxu1 %v1354_v15  ;;  %1223 = vmatprep.mubr.msk.f32.mxu1 %vm1449_vm0, %v1450_v11  ;;  %v864_v15 = vld [vmem:[%s1914_s2 + $0x48] sm:$0xff] }
  0x45   :  { %1356 = vmatprep.subr.bf16.mxu1 %v1448_v3  ;;  %v1294_v17 = vpack.c.bf16 %v864_v15, %v863_v14  ;;  %v895_v14 = vld [vmem:[%s1914_s2 + $0xa8] sm:$0xff] }
  0x47   :  { %1295 = vmatpush3.bf16.msra.mxu0 %v1294_v17  ;;  %v896_v17 = vld [vmem:[%s1914_s2 + $0xb0] sm:$0xff] }
  0x48   :  { %1358 = vmatpush3.bf16.msra.mxu1 %v1357_v18  ;;  %v866_v18 = vld [vmem:[%s1914_s2 + $0x58] sm:$0xff]  ;;  %1296 = vmatprep.subr.bf16.mxu0 %v1448_v3 }
  0x49   :  { %1359 = vmatprep.subr.bf16.mxu1 %v1448_v3  ;;  %v1297_v19 = vpack.c.bf16 %v866_v18, %v865_v16  ;;  %v897_v18 = vld [vmem:[%s1914_s2 + $0xb8] sm:$0xff] }
  0x4b   :  { %1298 = vmatpush3.bf16.msra.mxu0 %v1297_v19 }
  0x4c   :  { %1361 = vmatpush3.bf16.msra.mxu1 %v1360_v21  ;;  %v868_v21 = vld [vmem:[%s1914_s2 + $0x68] sm:$0xff]  ;;  %1299 = vmatprep.subr.bf16.mxu0 %v1448_v3 }
  0x4d   :  { %1362 = vmatprep.subr.bf16.mxu1 %v1448_v3  ;;  %v1300_v22 = vpack.c.bf16 %v868_v21, %v867_v20  ;;  %v1351_v20 = vpack.c.bf16 %v897_v18, %v896_v17 }
  0x4f   :  { %1301 = vmatpush3.bf16.msra.mxu0 %v1300_v22 }
  0x50   :  { %1364 = vmatpush3.bf16.msra.mxu1 %v1363_v24  ;;  %1302 = vmatprep.subr.bf16.mxu0 %v1448_v3 }
  0x51   :  { %1365 = vmatprep.subr.bf16.mxu1 %v1448_v3 }
  0x54   :  { %1367 = vmatpush3.bf16.msra.mxu1 %v1366_v27 }
  0x55   :  { %1368 = vmatprep.subr.bf16.mxu1 %v1448_v3 }
  0x58   :  { %1370 = vmatpush3.bf16.msra.mxu1 %v1369_v30 }
  0x59   :  { %1371 = vmatprep.subr.bf16.mxu1 %v1448_v3 }
  0x5c   :  { %1373 = vmatpush3.bf16.msra.mxu1 %v1372_v33  ;;  %v1303_v33 = vpack.c.bf16 %v870_v32, %v869_v31  ;;  %v920_v31 = vld [vmem:[%s1914_s2 + $0xe0] sm:$0xff]  ;;  %v921_v32 = vld [vmem:[%s1914_s2 + $0xe8] sm:$0xff] }
  0x5d   :  { %1374 = vmatprep.subr.bf16.mxu1 %v1448_v3 }
  0x5e   :  { %1304 = vmatpush3.bf16.msra.mxu0 %v1303_v33  ;;  %v1384_v33 = vpack.c.bf16 %v921_v32, %v920_v31 }
  0x5f   :  { %1305 = vmatprep.subr.bf16.mxu0 %v1448_v3 }
  0x60   :  { %1376 = vmatpush3.bf16.msra.mxu1 %v1375_v36 }
  0x63   :  { %1224 = vmatmul.mubr.f32.vlgmr.msra.gmra.mrb[4].mxu1 %v1608_v52 }
  0xf6   :  { %v235_v38 = vpop.f32.mrb[0].mxu1 }
  0xf7   :  { %v239_v39 = vsub.f32 %v235_v38, %v844_v37  ;;  %v1098_v40 = vpop.f32.mrb[1].mxu1  ;;  %v107_v41 = vpop.f32.mrb[0].mxu0 }
  0xf8   :  { %v117_v42 = vsub.f32 %v107_v41, %v844_v37  ;;  %v1063_v43 = vpop.f32.mrb[1].mxu0 }
  0xf9   :  { %v240_v44 = vsel %vm118_vm1, %v239_v39, -inf }
  0xfa   :  { %241 = vmax.xlane.f32.xlu0 %v240_v44  ;;  %v119_v45 = vsel %vm118_vm1, %v117_v42, -inf }
  0xfe   :  { %120 = vmax.xlane.f32.xlu0 %v119_v45 }
 0x116   :  { %v504_v46 = vpop.f32.mrb[2].mxu1 }
 0x117   :  { %v508_v47 = vsub.f32 %v504_v46, %v844_v37  ;;  %v1171_v48 = vpop.f32.mrb[3].mxu1 }
 0x118   :  { %v143_v48 = vld [vmem:[%s1914_s2 + $0x8] sm:$0xff] }
 0x119   :  { %v509_v49 = vsel %vm118_vm1, %v508_v47, -inf }
 0x11a   :  { %510 = vmax.xlane.f32.xlu1 %v509_v49 }
 0x136   :  { %v700_v50 = vpop.f32.mrb[4].mxu1 }
 0x137   :  { %v704_v51 = vsub.f32 %v700_v50, %v844_v37  ;;  %v1225_v52 = vpop.f32.mrb[5].mxu1 }
 0x139   :  { %v705_v53 = vsel %vm118_vm1, %v704_v51, -inf }
 0x13a   :  { %706 = vmax.xlane.f32.xlu1 %v705_v53 }
 0x187   :  { %v242_v56 = vpop.xlane.xlu0 %241 }
 0x188   :  { %vm243_vm2 = vcmp.eq.f32.partialorder %v239_v39, %v242_v56  ;;  %v145_v56 = vld [vmem:[%s1914_s2 + $0x18] sm:$0xff] }
 0x189   :  { %v244_v57 = vsel %vm243_vm2, %v1734_v55, 64  ;;  %vm814_vm2 = vcmask 27648  }
 0x18a   :  { %v245_v58 = vsel %vm118_vm1, %v244_v57, 2147483647 }
 0x18b   :  { %v121_v59 = vpop.xlane.xlu0 %120  ;;  %v247_v60 = vshra.s32 %v245_v58, 16  ;;  %v246_v23 = vand.u32 65535, %v245_v58 }
 0x18c   :  { %vm122_vm3 = vcmp.eq.f32.partialorder %v117_v42, %v121_v59  ;;  %v1309_v59 = vpack.c.bf16 %v145_v56, %v144_v54 }
 0x18d   :  { %v123_v61 = vsel %vm122_vm3, %v1734_v55, 64  ;;  %v249_v62 = vcvt.s32.f32 %v247_v60  ;;  %v248_v25 = vcvt.s32.f32 %v246_v23  ;;  %v916_v23 = vld [vmem:[%s1914_s2 + $0xc0] sm:$0xff] }
 0x18e   :  { %v124_v63 = vsel %vm118_vm1, %v123_v61, 2147483647  ;;  %v146_v61 = vld [vmem:[%s1914_s2 + $0x20] sm:$0xff] }
 0x18f   :  { %250 = vmin.xlane.f32.xlu0 %v249_v62  ;;  %v126_v0 = vshra.s32 %v124_v63, 16  ;;  %v125_v26 = vand.u32 65535, %v124_v63 }
 0x191   :  { %v128_v1 = vcvt.s32.f32 %v126_v0  ;;  %v127_v29 = vcvt.s32.f32 %v125_v26 }
 0x193   :  { %129 = vmin.xlane.f32.xlu1 %v128_v1 }
 0x1a7   :  { %v511_v2 = vpop.xlane.xlu1 %510 }
 0x1a8   :  { %vm512_vm4 = vcmp.eq.f32.partialorder %v508_v47, %v511_v2  ;;  %v142_v47 = vld [vmem:[%s1914_s2] sm:$0xff]  ;;  %v149_v2 = vld [vmem:[%s1914_s2 + $0x38] sm:$0xff] }
 0x1a9   :  { %v513_v4 = vsel %vm512_vm4, %v1734_v55, 64 }
 0x1aa   :  { %v514_v5 = vsel %vm118_vm1, %v513_v4, 2147483647 }
 0x1ab   :  { %v516_v6 = vshra.s32 %v514_v5, 16  ;;  %v515_v34 = vand.u32 65535, %v514_v5  ;;  %v890_v5 = vld [vmem:[%s1914_s2 + $0x80] sm:$0xff] }
 0x1ad   :  { %v518_v7 = vcvt.s32.f32 %v516_v6  ;;  %v517_v36 = vcvt.s32.f32 %v515_v34  ;;  %v891_v6 = vld [vmem:[%s1914_s2 + $0x88] sm:$0xff]  ;;  %v922_v34 = vld [vmem:[%s1914_s2 + $0xf0] sm:$0xff] }
 0x1af   :  { %519 = vmin.xlane.f32.xlu0 %v518_v7 }
 0x1c7   :  { %v707_v8 = vpop.xlane.xlu1 %706 }
 0x1c8   :  { %vm708_vm5 = vcmp.eq.f32.partialorder %v704_v51, %v707_v8  ;;  %v1306_v51 = vpack.c.bf16 %v143_v48, %v142_v47  ;;  %v892_v8 = vld [vmem:[%s1914_s2 + $0x90] sm:$0xff] }
 0x1c9   :  { %v709_v9 = vsel %vm708_vm5, %v1734_v55, 64 }
 0x1ca   :  { %v710_v10 = vsel %vm118_vm1, %v709_v9, 2147483647  ;;  %v893_v9 = vld [vmem:[%s1914_s2 + $0x98] sm:$0xff]  ;;  %vm811_vm1 = vcmp.eq.s32.totalorder %v1734_v55, 3 }
 0x1cb   :  { %v712_v12 = vshra.s32 %v710_v10, 16  ;;  %v711_v38 = vand.u32 65535, %v710_v10 }
 0x1cd   :  { %v714_v13 = vcvt.s32.f32 %v712_v12  ;;  %v713_v40 = vcvt.s32.f32 %v711_v38  ;;  %v1345_v12 = vpack.c.bf16 %v893_v9, %v892_v8 }
 0x1cf   :  { %715 = vmin.xlane.f32.xlu1 %v714_v13 }
 0x21c   :  { %v251_v24 = vpop.xlane.xlu0 %250 }
 0x21d   :  { %vm252_vm6 = vcmp.eq.f32.partialorder %v249_v62, %v251_v24  ;;  %v257_v42 = vcvt.f32.s32 %v251_v24  ;;  %v147_v62 = vld [vmem:[%s1914_s2 + $0x28] sm:$0xff] }
 0x21e   :  { %v253_v27 = vsel %vm252_vm6, %v248_v25, inf  ;;  %v1312_v0 = vpack.c.bf16 %v147_v62, %v146_v61  ;;  %v917_v24 = vld [vmem:[%s1914_s2 + $0xc8] sm:$0xff] }
 0x21f   :  { %254 = vmin.xlane.f32.xlu0 %v253_v27  ;;  %v258_v44 = vshll.u32 %v257_v42, 16  ;;  %v1378_v26 = vpack.c.bf16 %v917_v24, %v916_v23  ;;  %v918_v27 = vld [vmem:[%s1914_s2 + $0xd0] sm:$0xff] }
 0x220   :  { %v130_v28 = vpop.xlane.xlu1 %129 }
 0x221   :  { %vm131_vm7 = vcmp.eq.f32.partialorder %v128_v1, %v130_v28  ;;  %v136_v45 = vcvt.f32.s32 %v130_v28  ;;  %v148_v1 = vld [vmem:[%s1914_s2 + $0x30] sm:$0xff]  ;;  %v919_v28 = vld [vmem:[%s1914_s2 + $0xd8] sm:$0xff] }
 0x222   :  { %v132_v30 = vsel %vm131_vm7, %v127_v29, inf  ;;  %v1315_v4 = vpack.c.bf16 %v149_v2, %v148_v1 }
 0x223   :  { %133 = vmin.xlane.f32.xlu1 %v132_v30  ;;  %v137_v52 = vshll.u32 %v136_v45, 16  ;;  %v1381_v30 = vpack.c.bf16 %v919_v28, %v918_v27 }
 0x23c   :  { %v1772_v35 = vpop.xlane.xlu0 %519 }
 0x23d   :  { %vm521_vm8 = vcmp.eq.f32.partialorder %v518_v7, %v1772_v35  ;;  %v1342_v7 = vpack.c.bf16 %v891_v6, %v890_v5  ;;  %v526_v16 = vcvt.f32.s32 %v1772_v35  ;;  %v923_v35 = vld [vmem:[%s1914_s2 + $0xf8] sm:$0xff] }
 0x23e   :  { %v522_v37 = vsel %vm521_vm8, %v517_v36, inf  ;;  %v1387_v36 = vpack.c.bf16 %v923_v35, %v922_v34 }
 0x23f   :  { %523 = vmin.xlane.f32.xlu0 %v522_v37  ;;  %v527_v21 = vshll.u32 %v526_v16, 16 }
 0x25c   :  { %v1775_v39 = vpop.xlane.xlu1 %715 }
 0x25d   :  { %vm717_vm9 = vcmp.eq.f32.partialorder %v714_v13, %v1775_v39  ;;  %v894_v13 = vld [vmem:[%s1914_s2 + $0xa0] sm:$0xff]  ;;  %v722_v37 = vcvt.f32.s32 %v1775_v39  ;;  %s1451_s2 = smov [#allocation4]  }
 0x25e   :  { %v718_v41 = vsel %vm717_vm9, %v713_v40, inf  ;;  %v1348_v15 = vpack.c.bf16 %v895_v14, %v894_v13  ;;  %s832_s28 = sshll.u32 %s1451_s2, 4  ;;  %s833_s28 = int_to_ptr.vmem [resolvable:$true] %s832_s28 }
 0x25f   :  { %719 = vmin.xlane.f32.xlu1 %v718_v41  ;;  %v723_v40 = vshll.u32 %v722_v37, 16  ;;  %s1400_s29 = scalar_lea.vmem %s833_s28, 64  ;;  %p1405_p1 = scmp.lt.s32.totalorder %s833_s28, %s833_s28 }
 0x260   :  { %p1401_p0 = scmp.ne.s32.totalorder %s833_s28, %s1400_s29  ;;  %p1406_p2 = scmp.lt.s32.totalorder %s1400_s29, %s1400_s29 }
 0x262   :  { %p1407_p3 = por %p1406_p2, %p1405_p1 }
 0x264   :  { %p1408_p4 = pnand %p1407_p3, %p1401_p0 }
 0x2ac   :  { %v255_v43 = vpop.xlane.xlu0 %254 }
 0x2ad   :  { %v256_v46 = vcvt.f32.s32 %v255_v43 }
 0x2af   :  { %v259_v49 = vadd.s32 %v258_v44, %v256_v46 }
 0x2b0   :  { %v134_v50 = vpop.xlane.xlu1 %133 }
 0x2b1   :  { %vm260_vm11 = vcmp.eq.s32.totalorder %v1734_v55, %v259_v49  ;;  %v135_v53 = vcvt.f32.s32 %v134_v50 }
 0x2b2   :  { %v862_v57 = vsel %vm260_vm11, 1.0, %v1450_v11 }
 0x2b3   :  { %v138_v58 = vadd.s32 %v137_v52, %v135_v53  ;;  %1116 = vmatmul.mubr.msk.f32.vlgmr.msra.gmra.mrb[2].mxu0 %vm272_vm10, %v862_v57 }
 0x2b4   :  { %1307 = vmatpush3.bf16.msra.mxu0 %v1306_v51  ;;  %1134 = vmatprep.mubr.msk.f32.mxu0 %vm1449_vm0, %v1450_v11 }
 0x2b5   :  { %v151_v60 = vsel %vm150_vm12, %v138_v58, 0  ;;  %1308 = vmatprep.subr.bf16.mxu0 %v1448_v3  ;;  %vm139_vm14 = vcmp.eq.s32.totalorder %v1734_v55, %v138_v58 }
 0x2b6   :  { %v1804_v63 = vsel %vm419_vm13, %v259_v49, %v151_v60  ;;  %v845_v10 = vsel %vm139_vm14, 1.0, %v1450_v11 }
 0x2b8   :  { %1310 = vmatpush3.bf16.msra.mxu0 %v1309_v59 }
 0x2b9   :  { %1311 = vmatprep.subr.bf16.mxu0 %v1448_v3 }
 0x2bc   :  { %1313 = vmatpush3.bf16.msra.mxu0 %v1312_v0 }
 0x2bd   :  { %1314 = vmatprep.subr.bf16.mxu0 %v1448_v3 }
 0x2c0   :  { %1316 = vmatpush3.bf16.msra.mxu0 %v1315_v4 }
 0x2c1   :  { %1341 = vmatprep.subr.bf16.mxu0 %v1448_v3 }
 0x2c3   :  { %1135 = vmatmul.mubr.msk.f32.vlgmr.msra.gmra.mrb[2].mxu0 %vm272_vm10, %v845_v10 }
 0x2c4   :  { %1343 = vmatpush3.bf16.msra.mxu0 %v1342_v7  ;;  %1188 = vmatprep.mubr.msk.f32.mxu0 %vm1449_vm0, %v1450_v11 }
 0x2c5   :  { %1344 = vmatprep.subr.bf16.mxu0 %v1448_v3 }
 0x2c8   :  { %1346 = vmatpush3.bf16.msra.mxu0 %v1345_v12 }
 0x2c9   :  { %1347 = vmatprep.subr.bf16.mxu0 %v1448_v3 }
 0x2cc   :  { %1349 = vmatpush3.bf16.msra.mxu0 %v1348_v15  ;;  %v524_v19 = vpop.xlane.xlu0 %523 }
 0x2cd   :  { %v525_v22 = vcvt.f32.s32 %v524_v19  ;;  %1350 = vmatprep.subr.bf16.mxu0 %v1448_v3 }
 0x2cf   :  { %v528_v25 = vadd.s32 %v527_v21, %v525_v22 }
 0x2d0   :  { %1352 = vmatpush3.bf16.msra.mxu0 %v1351_v20 }
 0x2d1   :  { %vm529_vm15 = vcmp.eq.s32.totalorder %v1734_v55, %v528_v25  ;;  %1377 = vmatprep.subr.bf16.mxu0 %v1448_v3 }
 0x2d2   :  { %v889_v29 = vsel %vm529_vm15, 1.0, %v1450_v11 }
 0x2d3   :  { %1189 = vmatmul.mubr.msk.f32.vlgmr.msra.gmra.mrb[2].mxu0 %vm272_vm10, %v889_v29 }
 0x2d4   :  { %1379 = vmatpush3.bf16.msra.mxu0 %v1378_v26  ;;  %1242 = vmatprep.mubr.msk.f32.mxu0 %vm1449_vm0, %v1450_v11  ;;  %vm615_vm0 = vcmp.eq.s32.totalorder %v1734_v55, 2 }
 0x2d5   :  { %1380 = vmatprep.subr.bf16.mxu0 %v1448_v3  ;;  %v616_v43 = vsel %vm615_vm0, %v528_v25, %v1804_v63 }
 0x2d8   :  { %1382 = vmatpush3.bf16.msra.mxu0 %v1381_v30 }
 0x2d9   :  { %1383 = vmatprep.subr.bf16.mxu0 %v1448_v3 }
 0x2dc   :  { %1385 = vmatpush3.bf16.msra.mxu0 %v1384_v33 }
 0x2dd   :  { %1386 = vmatprep.subr.bf16.mxu0 %v1448_v3 }
 0x2e0   :  { %1388 = vmatpush3.bf16.msra.mxu0 %v1387_v36 }
 0x2ec   :  { %v720_v38 = vpop.xlane.xlu1 %719 }
 0x2ed   :  { %v721_v41 = vcvt.f32.s32 %v720_v38 }
 0x2ef   :  { %v724_v42 = vadd.s32 %v723_v40, %v721_v41 }
 0x2f1   :  { %vm725_vm3 = vcmp.eq.s32.totalorder %v1734_v55, %v724_v42  ;;  %v812_v44 = vsel %vm811_vm1, %v724_v42, %v616_v43 }
 0x2f2   :  { %v915_v45 = vsel %vm725_vm3, 1.0, %v1450_v11  ;;  %815 = vst.msk [vmem:[#allocation4] sm:$0xf] %vm814_vm2, %v812_v44 }
 0x2f3   :  { %1243 = vmatmul.mubr.msk.f32.vlgmr.msra.gmra.mrb[2].mxu0 %vm272_vm10, %v915_v45 }
 0x2f4   :  { %1411 = shalt.err (!%p1408_p4)
}
 0x2f5   :  { %s1412_s7 = scalar_lea.hbm %s1917_s5, 64 }
 0x2f6   :  { %p1413_p5 = scmp.ne.s32.totalorder %s1917_s5, %s1412_s7  ;;  %p1416_p6 = scmp.lt.u32.totalorder %s1412_s7, %s1917_s5 }
 0x2f8   :  { %p1418_p7 = pnand %p1416_p6, %p1413_p5 }
 0x2fa   :  { %1421 = shalt.err (!%p1418_p7)
}
 0x2fb   :  { %835 = dma.vmem_to_hbm [thread:$0]  %s833_s28, 64, %s1917_s5, [#allocation5]  }
 0x2fc   :  { %s1452_s14 = smov [#allocation2]  }
 0x2fd   :  { %s822_s15 = sshll.u32 %s1452_s14, 4  ;;  %s823_s15 = int_to_ptr.vmem [resolvable:$true] %s822_s15 }
 0x2fe   :  { %s1422_s16 = scalar_lea.vmem %s823_s15, 64  ;;  %p1427_p9 = scmp.lt.s32.totalorder %s823_s15, %s823_s15 }
 0x2ff   :  { %p1423_p8 = scmp.ne.s32.totalorder %s823_s15, %s1422_s16  ;;  %p1428_p10 = scmp.lt.s32.totalorder %s1422_s16, %s1422_s16 }
 0x301   :  { %p1429_p11 = por %p1428_p10, %p1427_p9 }
 0x303   :  { %p1430_p12 = pnand %p1429_p11, %p1423_p8 }
 0x3c6   :  { %v806_v3 = vpop.f32.mrb[2].mxu0 }
 0x3c7   :  { %813 = vst [vmem:[#allocation2] sm:$0xf] %v806_v3  ;;  %v1244_v11 = vpop.f32.mrb[3].mxu0 }
 0x3c8   :  { %1433 = shalt.err (!%p1430_p12)
}
 0x3c9   :  { %s1434_s18 = scalar_lea.hbm %s1916_s4, 64 }
 0x3ca   :  { %p1435_p13 = scmp.ne.s32.totalorder %s1916_s4, %s1434_s18  ;;  %p1438_p0 = scmp.lt.u32.totalorder %s1434_s18, %s1916_s4 }
 0x3cc   :  { %p1440_p1 = pnand %p1438_p0, %p1435_p13 }
 0x3ce   :  { %1443 = shalt.err (!%p1440_p1)
}
 0x3cf   :  { %825 = dma.vmem_to_hbm [thread:$0]  %s823_s15, 64, %s1916_s4, [#allocation3]  }
 0x3d0   :  { %1444 = dma.done.wait [#allocation3], 64  }
 0x3d1   :  { %1445 = vsyncadd [#allocation3], 4294967232 }
 0x3d2   :  { %1446 = dma.done.wait [#allocation5], 64  }
 0x3d3   :  { %1447 = vsyncadd [#allocation5], 4294967232 }
 0x3d4   :  { %842 = vsyncpa [#allocation3], 1 }
 0x3d5   :  { %843 = vsyncpa [#allocation5], 1 }

</bundles_post_ra>
